<compile_context>
chip_gen: v5e
topology: v5e:2x2
jax: 0.10.0
libtpu: 0.0.40
codegen_flags: <defaults>
</compile_context>

<pallas_src>
import functools

import numpy as np
import jax
import jax.numpy as jnp
from jax import lax
from jax.experimental import pallas as pl
from jax.experimental.pallas import tpu as pltpu


_OCTANT_ORDER = (0, 4, 6, 7, 2, 3, 7, 1)  # natural octant index of x0..x7


# ----------------------------- Pallas kernel --------------------------------

def _merge_kernel(x_ref, w_ref, acc_ref, s_ref, *, mm_dtype):
    """Fused pass: acc = x @ Wg (gamma/permutation pre-folded into Wg) plus
    per-channel [sum; sum-of-squares] accumulation for GroupNorm(1, 8C).

    x_ref:   (tile_p, pack*8C)  gathered + lane-packed input block
    w_ref:   (pack*8C, pack*2C) block-diagonal gamma-folded weight
    acc_ref: (tile_p, pack*2C)  un-normalized conv output block (lane-dense)
    s_ref:   (2, pack*8C)       resident accumulator across the si axis
    """
    si = pl.program_id(2)

    @pl.when(si == 0)
    def _init():
        s_ref[...] = jnp.zeros_like(s_ref)

    x = x_ref[...]
    xf = x.astype(jnp.float32)
    s_ref[0:1, :] = s_ref[0:1, :] + jnp.sum(xf, axis=0, keepdims=True)
    s_ref[1:2, :] = s_ref[1:2, :] + jnp.sum(xf * xf, axis=0, keepdims=True)

    y = jnp.dot(x.astype(mm_dtype), w_ref[...],
                preferred_element_type=jnp.float32)
    acc_ref[...] = y.astype(acc_ref.dtype)


# ------------------------------- sizing helpers ------------------------------

def _vmem_limit_bytes():
    """Per-kernel VMEM limit derived from the chip (v7x: 64 MiB physical)."""
    try:
        cap = int(pltpu.get_tpu_info().vmem_capacity_bytes)
    except Exception:
        cap = 64 << 20                     # conservative fallback (v7x)
    return max(16 << 20, min(cap * 3 // 4, 96 << 20))


def _pick_tile(n_rows_p, c_in_p, c_out_p, storage_isz, acc_isz, mm_isz,
               *, vmem_budget_bytes, max_tile=1024, min_tile=16):
    """Largest 16-aligned packed-row tile whose double-buffered blocks plus
    in-kernel f32 temporaries fit the VMEM budget."""
    fixed = 2 * c_in_p * c_out_p * mm_isz + 2 * 2 * c_in_p * 4     # weight + stats
    per_row = (2 * c_in_p * storage_isz        # input block, double-buffered
               + 2 * c_out_p * acc_isz         # acc block, double-buffered
               + 2 * c_in_p * 4)               # in-kernel f32 temporaries
    avail = max(vmem_budget_bytes - fixed, min_tile * per_row)
    t = min(max_tile, int(avail) // per_row)
    t = max(min_tile, (int(t) // 16) * 16)
    n_aligned = ((n_rows_p + 15) // 16) * 16
    return max(min_tile, min(t, n_aligned))


# --------------------------------- forward ----------------------------------

def patch_merging_forward(x, params, *, eps=1e-5, tile_rows=None, n_split=None,
                          storage_dtype=None, compute_dtype=None, acc_dtype=None):
    """PatchMerging forward.  x: (B, C, D, H, W) -> (B, 2C, D/2, H/2, W/2)."""
    B, C, D, H, W = x.shape
    assert D % 2 == 0 and H % 2 == 0 and W % 2 == 0, "spatial dims must be even"
    w = params["reduction"]["w"]                                   # (8C, 2C)
    c8, cout = w.shape
    assert c8 == 8 * C
    gamma = params["norm"]["g"].astype(jnp.float32)
    beta = params["norm"]["b"].astype(jnp.float32)
    w_f32 = w.astype(jnp.float32)

    storage = np.dtype(storage_dtype) if storage_dtype is not None else np.dtype(x.dtype)
    mm_dtype = np.dtype(compute_dtype) if compute_dtype is not None else np.dtype(jnp.float32)
    if acc_dtype is not None:
        acc_dt = np.dtype(acc_dtype)
    else:
        acc_dt = (np.dtype(jnp.bfloat16) if storage == np.dtype(jnp.bfloat16)
                  else np.dtype(jnp.float32))

    # Fold the reference octant permutation into the parameters: reference
    # channel j maps to natural channel nat_idx[j]; duplicated octant rows sum
    # and the unused [1,0,1] octant's rows stay zero.
    nat_idx = np.asarray(
        [_OCTANT_ORDER[j // C] * C + (j % C) for j in range(c8)], np.int32)
    mult = np.zeros(8, np.float32)
    for o in _OCTANT_ORDER:
        mult[o] += 1.0                      # (1,1,1) counted twice, (1,0,1) zero
    mult_c = jnp.asarray(np.repeat(mult, C))                       # (8C,)

    wg = jnp.zeros((c8, cout), jnp.float32).at[nat_idx].add(gamma[:, None] * w_f32)
    gw_sum = gamma @ w_f32                                         # (2C,)
    bw_sum = beta @ w_f32                                          # (2C,)

    # Octant gather: one fused reshape/transpose, no jnp.take.
    D2, H2, W2 = D // 2, H // 2, W // 2
    n = D2 * H2 * W2
    x8 = (x.astype(storage)
            .reshape(B, C, D2, 2, H2, 2, W2, 2)
            .transpose(0, 2, 4, 6, 3, 5, 7, 1)
            .reshape(B, n, c8))
    # TODO(synk): replace this XLA transpose with a manual-DMA gather so the
    # 8C-wide intermediate never materializes in HBM.

    # Lane-dense output: pack rows into lanes when 2C < 128.
    pack = 128 // cout if (cout < 128 and 128 % cout == 0) else 1
    c_in_p, c_out_p = pack * c8, pack * cout

    vmem_limit = _vmem_limit_bytes()
    n_p_raw = pl.cdiv(n, pack)
    tile_p = tile_rows or _pick_tile(
        n_p_raw, c_in_p, c_out_p,
        storage.itemsize, acc_dt.itemsize, mm_dtype.itemsize,
        vmem_budget_bytes=min(24 << 20, vmem_limit // 2))

    raw_tiles = pl.cdiv(n_p_raw, tile_p)
    if n_split is None:                      # give both v7x TCs work at small B
        n_split = 1 if B >= 4 else max(1, 4 // B)
    n_split = max(1, min(int(n_split), raw_tiles))
    n_inner = pl.cdiv(raw_tiles, n_split)
    n_tiles = n_split * n_inner
    n_pad = n_tiles * tile_p * pack
    if n_pad != n:
        x8 = jnp.pad(x8, ((0, 0), (0, n_pad - n), (0, 0)))         # zero rows: stats-safe
    x8p = x8.reshape(B, n_pad // pack, c_in_p)                     # free row-major view

    w_mm = wg.astype(mm_dtype)
    w_big = jnp.kron(jnp.eye(pack, dtype=mm_dtype), w_mm) if pack > 1 else w_mm

    grid = (B, n_split, n_inner)
    acc_shape = jax.ShapeDtypeStruct((B, n_pad // pack, c_out_p), acc_dt)
    stats_shape = jax.ShapeDtypeStruct((B, n_split, 2, c_in_p), jnp.float32)

    acc, stats = pl.pallas_call(
        functools.partial(_merge_kernel, mm_dtype=mm_dtype),
        out_shape=(acc_shape, stats_shape),
        grid=grid,
        in_specs=[
            pl.BlockSpec((None, tile_p, c_in_p),
                         lambda b, so, si: (b, so * n_inner + si, 0)),
            pl.BlockSpec((c_in_p, c_out_p), lambda b, so, si: (0, 0)),
        ],
        out_specs=[
            pl.BlockSpec((None, tile_p, c_out_p),
                         lambda b, so, si: (b, so * n_inner + si, 0)),
            pl.BlockSpec((None, None, 2, c_in_p),
                         lambda b, so, si: (b, so, 0, 0)),
        ],
        compiler_params=pltpu.CompilerParams(
            dimension_semantics=("parallel", "parallel", "arbitrary"),
            vmem_limit_bytes=vmem_limit),
    )(x8p, w_big)

    # Per-sample GroupNorm(1, 8C) finalize (tiny) using multiplicity weights.
    s = jnp.sum(stats, axis=1).reshape(B, 2, pack, c8).sum(axis=2)  # (B, 2, 8C)
    count = jnp.float32(n * c8)             # reference element count (8C channels)
    t1 = jnp.einsum("bc,c->b", s[:, 0, :], mult_c)
    t2 = jnp.einsum("bc,c->b", s[:, 1, :], mult_c)
    mean = t1 / count
    var = jnp.maximum(t2 / count - mean * mean, 0.0)
    # TODO(synk): use a shifted two-pass variance if inputs can carry a large
    # DC offset (E[x^2]-E[x]^2 cancellation).
    inv = lax.rsqrt(var + eps)                                      # (B,)
    bias = bw_sum[None, :] - (inv * mean)[:, None] * gw_sum[None, :]  # (B, 2C)

    # Epilogue over the small 2C-wide accumulator (plain XLA, fused with the
    # layout change back to NCDHW).
    y = inv[:, None, None] * acc.astype(jnp.float32) \
        + jnp.tile(bias, (1, pack))[:, None, :]
    y = y.reshape(B, n_pad, cout)[:, :n, :].astype(x.dtype)
    y = y.reshape(B, D2, H2, W2, cout)
    return jnp.transpose(y, (0, 4, 1, 2, 3))                        # NCDHW


# --------------------------- pure-JAX reference ------------------------------

def patch_merging_reference(x, params, eps=1e-5):
    """Pure-JAX NCDHW reference matching the PyTorch forward."""
    x0 = x[:, :, 0::2, 0::2, 0::2]
    x1 = x[:, :, 1::2, 0::2, 0::2]
    x2 = x[:, :, 1::2, 1::2, 0::2]
    x3 = x[:, :, 1::2, 1::2, 1::2]
    x4 = x[:, :, 0::2, 1::2, 0::2]
    x5 = x[:, :, 0::2, 1::2, 1::2]
    x6 = x[:, :, 1::2, 1::2, 1::2]
    x7 = x[:, :, 0::2, 0::2, 1::2]
    xc = jnp.concatenate([x0, x1, x2, x3, x4, x5, x6, x7], axis=1)
    mean = jnp.mean(xc, axis=(1, 2, 3, 4), keepdims=True)
    var = jnp.mean(jnp.square(xc - mean), axis=(1, 2, 3, 4), keepdims=True)
    g = params["norm"]["g"].reshape(1, -1, 1, 1, 1)
    b = params["norm"]["b"].reshape(1, -1, 1, 1, 1)
    xn = (xc - mean) * lax.rsqrt(var + eps) * g + b
    return jnp.einsum("bcdhw,ce->bedhw", xn, params["reduction"]["w"],
                      precision=lax.Precision.HIGHEST)


# ----------------------------------- main ------------------------------------

if __name__ == "__main__":
    B, C, D, H, W = 2, 16, 16, 16, 16       # dim=16 -> 8C = 128 (lane-dense)
    key = jax.random.PRNGKey(0)
    kx, kg, kb, kw = jax.random.split(key, 4)
    x = jax.random.normal(kx, (B, C, D, H, W), jnp.float32)
    c8, cout = 8 * C, 2 * C
    params = {
        "norm": {"g": 1.0 + 0.1 * jax.random.normal(kg, (c8,), jnp.float32),
                 "b": 0.1 * jax.random.normal(kb, (c8,), jnp.float32)},
        "reduction": {"w": 0.05 * jax.random.normal(kw, (c8, cout), jnp.float32)},
    }

    y_ref = patch_merging_reference(x, params)

    # f32 path (default): bit-faithful to the reference within f32 tolerance.
    fwd = jax.jit(patch_merging_forward)
    y = fwd(x, params)
    jax.block_until_ready(y)
    assert y.shape == (B, cout, D // 2, H // 2, W // 2), y.shape
    assert bool(jnp.all(jnp.isfinite(y)))
    err = float(jnp.max(jnp.abs(y - y_ref)))
    assert err < 5e-3, f"f32 path max abs err {err}"

    # bf16-storage / bf16-MXU path: halves HBM bytes on the dominant tensor.
    fwd_bf16 = jax.jit(functools.partial(patch_merging_forward,
                                         storage_dtype=jnp.bfloat16,
                                         compute_dtype=jnp.bfloat16))
    y16 = fwd_bf16(x, params)
    jax.block_until_ready(y16)
    assert bool(jnp.all(jnp.isfinite(y16)))
    err16 = float(jnp.max(jnp.abs(y16.astype(jnp.float32) - y_ref)))
    assert err16 < 5e-2, f"bf16 path max abs err {err16}"

    print("KERNEL_OK")
</pallas_src>

<mosaic_0001>
module attributes {stable_mosaic.version = 11 : i64} {
  func.func @_merge_kernel(%arg0: i32, %arg1: i32, %arg2: i32, %arg3: memref<1x128x512xf32, #tpu.memory_space<vmem>>, %arg4: memref<512x128xf32, #tpu.memory_space<vmem>>, %arg5: memref<1x128x128xf32, #tpu.memory_space<vmem>>, %arg6: memref<1x1x2x512xf32, #tpu.memory_space<vmem>>) attributes {dimension_semantics = [#tpu.dimension_semantics<parallel>, #tpu.dimension_semantics<parallel>, #tpu.dimension_semantics<arbitrary>], iteration_bounds = array<i64: 2, 1, 1>, scalar_prefetch = 0 : i64, scratch_operands = 0 : i64, tpu.core_type = #tpu.core_type<tc>, window_params = [{transform_indices = @transform_0, window_bounds = array<i64: 1, 128, 512>}, {pipeline_mode = #tpu.pipeline_mode<synchronous>, transform_indices = @transform_1, window_bounds = array<i64: 512, 128>}, {transform_indices = @transform_2, window_bounds = array<i64: 1, 128, 128>}, {transform_indices = @transform_3, window_bounds = array<i64: 1, 1, 2, 512>}]} {
    %c0_i32 = arith.constant 0 : i32
    %0 = arith.cmpi eq, %arg2, %c0_i32 : i32
    %1 = arith.extui %0 : i1 to i32
    %c0_i32_0 = arith.constant 0 : i32
    %2 = arith.cmpi ne, %1, %c0_i32_0 : i32
    scf.if %2 {
      %cst_25 = arith.constant 0.000000e+00 : f32
      %27 = vector.broadcast %cst_25 : f32 to vector<2x512xf32>
      %c0_26 = arith.constant 0 : index
      %c0_27 = arith.constant 0 : index
      %c0_28 = arith.constant 0 : index
      %c0_29 = arith.constant 0 : index
      %28 = vector.load %arg6[%c0_26, %c0_27, %c0_28, %c0_29] : memref<1x1x2x512xf32, #tpu.memory_space<vmem>>, vector<1x1x2x512xf32>
      %29 = vector.shape_cast %28 : vector<1x1x2x512xf32> to vector<2x512xf32>
      %30 = vector.shape_cast %27 : vector<2x512xf32> to vector<1x1x2x512xf32>
      tpu.vector_store %arg6[%c0_26, %c0_27, %c0_28, %c0_29], %30 {strides = array<i32>} : memref<1x1x2x512xf32, #tpu.memory_space<vmem>>, vector<1x1x2x512xf32>,
    } else {
    }
    %c0 = arith.constant 0 : index
    %c0_1 = arith.constant 0 : index
    %c0_2 = arith.constant 0 : index
    %3 = vector.load %arg3[%c0, %c0_1, %c0_2] : memref<1x128x512xf32, #tpu.memory_space<vmem>>, vector<1x128x512xf32>
    %4 = vector.shape_cast %3 : vector<1x128x512xf32> to vector<128x512xf32>
    %c0_3 = arith.constant 0 : index
    %c0_4 = arith.constant 0 : index
    %c0_5 = arith.constant 0 : index
    %c0_6 = arith.constant 0 : index
    %5 = vector.load %arg6[%c0_3, %c0_4, %c0_5, %c0_6] : memref<1x1x2x512xf32, #tpu.memory_space<vmem>>, vector<1x1x1x512xf32>
    %6 = vector.shape_cast %5 : vector<1x1x1x512xf32> to vector<1x512xf32>
    %cst = arith.constant dense<0.000000e+00> : vector<512xf32>
    %7 = vector.multi_reduction <add>, %4, %cst [0] : vector<128x512xf32> to vector<512xf32>
    %8 = vector.shape_cast %7 : vector<512xf32> to vector<1x512xf32>
    %9 = arith.addf %6, %8 : vector<1x512xf32>
    %c0_7 = arith.constant 0 : index
    %c0_8 = arith.constant 0 : index
    %c0_9 = arith.constant 0 : index
    %c0_10 = arith.constant 0 : index
    %10 = vector.load %arg6[%c0_7, %c0_8, %c0_9, %c0_10] : memref<1x1x2x512xf32, #tpu.memory_space<vmem>>, vector<1x1x1x512xf32>
    %11 = vector.shape_cast %10 : vector<1x1x1x512xf32> to vector<1x512xf32>
    %12 = vector.shape_cast %9 : vector<1x512xf32> to vector<1x1x1x512xf32>
    tpu.vector_store %arg6[%c0_7, %c0_8, %c0_9, %c0_10], %12 {strides = array<i32>} : memref<1x1x2x512xf32, #tpu.memory_space<vmem>>, vector<1x1x1x512xf32>,
    %c0_11 = arith.constant 0 : index
    %c0_12 = arith.constant 0 : index
    %c1 = arith.constant 1 : index
    %c0_13 = arith.constant 0 : index
    %13 = vector.load %arg6[%c0_11, %c0_12, %c1, %c0_13] : memref<1x1x2x512xf32, #tpu.memory_space<vmem>>, vector<1x1x1x512xf32>
    %14 = vector.shape_cast %13 : vector<1x1x1x512xf32> to vector<1x512xf32>
    %15 = arith.mulf %4, %4 : vector<128x512xf32>
    %cst_14 = arith.constant dense<0.000000e+00> : vector<512xf32>
    %16 = vector.multi_reduction <add>, %15, %cst_14 [0] : vector<128x512xf32> to vector<512xf32>
    %17 = vector.shape_cast %16 : vector<512xf32> to vector<1x512xf32>
    %18 = arith.addf %14, %17 : vector<1x512xf32>
    %c0_15 = arith.constant 0 : index
    %c0_16 = arith.constant 0 : index
    %c1_17 = arith.constant 1 : index
    %c0_18 = arith.constant 0 : index
    %19 = vector.load %arg6[%c0_15, %c0_16, %c1_17, %c0_18] : memref<1x1x2x512xf32, #tpu.memory_space<vmem>>, vector<1x1x1x512xf32>
    %20 = vector.shape_cast %19 : vector<1x1x1x512xf32> to vector<1x512xf32>
    %21 = vector.shape_cast %18 : vector<1x512xf32> to vector<1x1x1x512xf32>
    tpu.vector_store %arg6[%c0_15, %c0_16, %c1_17, %c0_18], %21 {strides = array<i32>} : memref<1x1x2x512xf32, #tpu.memory_space<vmem>>, vector<1x1x1x512xf32>,
    %c0_19 = arith.constant 0 : index
    %c0_20 = arith.constant 0 : index
    %22 = vector.load %arg4[%c0_19, %c0_20] : memref<512x128xf32, #tpu.memory_space<vmem>>, vector<512x128xf32>
    %cst_21 = arith.constant dense<0.000000e+00> : vector<128x128xf32>
    %23 = tpu.matmul %4, %22, %cst_21 {dimension_numbers = #tpu.dot_dimension_numbers<[1], [0], [0], [1], [0, 0, 1, 1], [], []>} : vector<128x512xf32>, vector<512x128xf32>, vector<128x128xf32> -> vector<128x128xf32>
    %c0_22 = arith.constant 0 : index
    %c0_23 = arith.constant 0 : index
    %c0_24 = arith.constant 0 : index
    %24 = vector.load %arg5[%c0_22, %c0_23, %c0_24] : memref<1x128x128xf32, #tpu.memory_space<vmem>>, vector<1x128x128xf32>
    %25 = vector.shape_cast %24 : vector<1x128x128xf32> to vector<128x128xf32>
    %26 = vector.shape_cast %23 : vector<128x128xf32> to vector<1x128x128xf32>
    tpu.vector_store %arg5[%c0_22, %c0_23, %c0_24], %26 {strides = array<i32>} : memref<1x128x128xf32, #tpu.memory_space<vmem>>, vector<1x128x128xf32>,
    return
  }
  func.func @transform_0(%arg0: i32, %arg1: i32, %arg2: i32) -> (i32, i32, i32) {
    %c1_i32 = arith.constant 1 : i32
    %0 = arith.muli %arg1, %c1_i32 : i32
    %1 = arith.addi %0, %arg2 : i32
    %c0_i32 = arith.constant 0 : i32
    %c0_i32_0 = arith.constant 0 : i32
    return %arg0, %1, %c0_i32 : i32, i32, i32
  }
  func.func @transform_1(%arg0: i32, %arg1: i32, %arg2: i32) -> (i32, i32) {
    %c0_i32 = arith.constant 0 : i32
    %c0_i32_0 = arith.constant 0 : i32
    %c0_i32_1 = arith.constant 0 : i32
    return %c0_i32, %c0_i32_0 : i32, i32
  }
  func.func @transform_2(%arg0: i32, %arg1: i32, %arg2: i32) -> (i32, i32, i32) {
    %c1_i32 = arith.constant 1 : i32
    %0 = arith.muli %arg1, %c1_i32 : i32
    %1 = arith.addi %0, %arg2 : i32
    %c0_i32 = arith.constant 0 : i32
    %c0_i32_0 = arith.constant 0 : i32
    return %arg0, %1, %c0_i32 : i32, i32, i32
  }
  func.func @transform_3(%arg0: i32, %arg1: i32, %arg2: i32) -> (i32, i32, i32, i32) {
    %c0_i32 = arith.constant 0 : i32
    %c0_i32_0 = arith.constant 0 : i32
    %c0_i32_1 = arith.constant 0 : i32
    return %arg0, %arg1, %c0_i32, %c0_i32_0 : i32, i32, i32, i32
  }
}

</mosaic_0001>

<bundles_post_ra>
// kernel: patch_merging_forward.1
= control target key start
LH: loop header
LB: loop body
LE: loop exit
PB: predicated region body
PF: predicated region fallthrough
CT: control target
= control target key end

     0   :  { %s1169_s12 = smov 0   ;;  %s1171_s13 = smov 0   ;;  %s1663_s0 = inlined_call_operand.vmem [shape: f32[2,128,512], index: 0, kind: input, shape index: {}]   ;;  %s1664_s1 = inlined_call_operand.vmem [shape: f32[512,128], index: 1, kind: input, shape index: {}]   ;;  %s1665_s2 = inlined_call_operand.vmem [shape: f32[2,128,128], index: 2, kind: output, shape index: {0}]   ;;  %s1666_s3 = inlined_call_operand.vmem [shape: f32[2,1,2,512], index: 3, kind: output, shape index: {1}]  }
   0x1   :  { %s1173_s14 = smov 0  }
   0x2 LB: > { %s33_s15 = sadd.s32 1, %s1142_s13  ;;  %p1085_p0 = scmp.ge.s32.totalorder %s1146_s14, 1  ;;  %s1146_s14 = sphi %s1173_s14, %s14_s14   ;;  %s1142_s13 = sphi %s1171_s13, %s1670_s13   ;;  %s1138_s12 = sphi %s1169_s12, %s1669_s12  }
   0x3   : > { %p35_p1 = scmp.ge.s32.totalorder %s33_s15, 2  ;;  %p177_p2 = scmp.lt.s32.totalorder %s1146_s14, 3 }
   0x5   : > { %s1672_s15 = smov (%p35_p1, %s33_s15), 0  ;;  %p178_p3 = pnand %p1085_p0, %p177_p2 }
   0x6   : > { %p223_p4 = scmp.lt.s32.totalorder (!%p178_p3), %s1138_s12, 1 }
   0x7   : > { %181 = sbr.rel (%p178_p3) target bundleno = 302 (0x12e), region = 28 }
   0xc   : > { %v639_v0 = vld [vmem:[%s1664_s1 + $0x178] sm:$0xff]  ;;  %v638_v1 = vld [vmem:[%s1664_s1 + $0x170] sm:$0xff]  ;;  %v637_v5 = vld [vmem:[%s1664_s1 + $0x168] sm:$0xff]  ;;  %s1674_s12 = smov (!%p223_p4, %s1138_s12), 1  ;;  %vm418_vm0 = vcmask 1042434   ;;  %vm416_vm1 = vcmask 1040384  }
   0xd   : > { %v655_v2 = vld [vmem:[%s1664_s1 + $0x1f8] sm:$0xff]  ;;  %786 = vmatpush.msra.mxu2 %v639_v0  ;;  %v654_v6 = vld [vmem:[%s1664_s1 + $0x1f0] sm:$0xff]  ;;  %v653_v9 = vld [vmem:[%s1664_s1 + $0x1e8] sm:$0xff]  ;;  %s1096_s28 = sshll.u32 %s1674_s12, 9  ;;  %s1098_s6 = sshll.u32 %s1674_s12, 3  ;;  %vm420_vm2 = vcmask 1041408  }
   0xe   : > { %851 = vmatpush.msra.mxu3 %v655_v2  ;;  %v607_v3 = vld [vmem:[%s1664_s1 + $0x78] sm:$0xff]  ;;  %v606_v7 = vld [vmem:[%s1664_s1 + $0x70] sm:$0xff]  ;;  %v605_v10 = vld [vmem:[%s1664_s1 + $0x68] sm:$0xff]  ;;  %s1373_s20 = scalar_lea.vmem %s1663_s0, %s1096_s28  ;;  %s1579_s9 = scalar_lea.vmem %s1666_s3, %s1098_s6 }
   0xf   : > { %v623_v4 = vld [vmem:[%s1664_s1 + $0xf8] sm:$0xff]  ;;  %656 = vmatpush.msra.mxu0 %v607_v3  ;;  %v622_v8 = vld [vmem:[%s1664_s1 + $0xf0] sm:$0xff]  ;;  %787 = vmatpush.msra.mxu2 %v638_v1  ;;  %v636_v11 = vld [vmem:[%s1664_s1 + $0x160] sm:$0xff]  ;;  %s1097_s10 = sshll.u32 %s1674_s12, 7 }
  0x10   : > { %721 = vmatpush.msra.mxu1 %v623_v4  ;;  %852 = vmatpush.msra.mxu3 %v654_v6  ;;  %v621_v12 = vld [vmem:[%s1664_s1 + $0xe8] sm:$0xff]  ;;  %v652_v13 = vld [vmem:[%s1664_s1 + $0x1e0] sm:$0xff]  ;;  %v635_v16 = vld [vmem:[%s1664_s1 + $0x158] sm:$0xff]  ;;  %s1636_s17 = scalar_lea.vmem %s1665_s2, %s1097_s10 }
  0x11   : > { %657 = vmatpush.msra.mxu0 %v606_v7  ;;  %788 = vmatpush.msra.mxu2 %v637_v5  ;;  %v604_v14 = vld [vmem:[%s1664_s1 + $0x60] sm:$0xff]  ;;  %v651_v17 = vld [vmem:[%s1664_s1 + $0x1d8] sm:$0xff]  ;;  %v634_v20 = vld [vmem:[%s1664_s1 + $0x150] sm:$0xff] }
  0x12   : > { %722 = vmatpush.msra.mxu1 %v622_v8  ;;  %853 = vmatpush.msra.mxu3 %v653_v9  ;;  %v620_v15 = vld [vmem:[%s1664_s1 + $0xe0] sm:$0xff]  ;;  %v603_v18 = vld [vmem:[%s1664_s1 + $0x58] sm:$0xff]  ;;  %v650_v21 = vld [vmem:[%s1664_s1 + $0x1d0] sm:$0xff] }
  0x13   : > { %658 = vmatpush.msra.mxu0 %v605_v10  ;;  %789 = vmatpush.msra.mxu2 %v636_v11  ;;  %v619_v19 = vld [vmem:[%s1664_s1 + $0xd8] sm:$0xff]  ;;  %v602_v22 = vld [vmem:[%s1664_s1 + $0x50] sm:$0xff]  ;;  %v633_v24 = vld [vmem:[%s1664_s1 + $0x148] sm:$0xff] }
  0x14   : > { %723 = vmatpush.msra.mxu1 %v621_v12  ;;  %854 = vmatpush.msra.mxu3 %v652_v13  ;;  %v618_v23 = vld [vmem:[%s1664_s1 + $0xd0] sm:$0xff]  ;;  %v649_v25 = vld [vmem:[%s1664_s1 + $0x1c8] sm:$0xff]  ;;  %v632_v28 = vld [vmem:[%s1664_s1 + $0x140] sm:$0xff] }
  0x15   : > { %659 = vmatpush.msra.mxu0 %v604_v14  ;;  %790 = vmatpush.msra.mxu2 %v635_v16  ;;  %v601_v26 = vld [vmem:[%s1664_s1 + $0x48] sm:$0xff]  ;;  %v648_v29 = vld [vmem:[%s1664_s1 + $0x1c0] sm:$0xff]  ;;  %v631_v32 = vld [vmem:[%s1664_s1 + $0x138] sm:$0xff] }
  0x16   : > { %724 = vmatpush.msra.mxu1 %v620_v15  ;;  %855 = vmatpush.msra.mxu3 %v651_v17  ;;  %v617_v27 = vld [vmem:[%s1664_s1 + $0xc8] sm:$0xff]  ;;  %v600_v30 = vld [vmem:[%s1664_s1 + $0x40] sm:$0xff]  ;;  %v647_v33 = vld [vmem:[%s1664_s1 + $0x1b8] sm:$0xff] }
  0x17   : > { %660 = vmatpush.msra.mxu0 %v603_v18  ;;  %791 = vmatpush.msra.mxu2 %v634_v20  ;;  %v616_v31 = vld [vmem:[%s1664_s1 + $0xc0] sm:$0xff]  ;;  %v599_v34 = vld [vmem:[%s1664_s1 + $0x38] sm:$0xff]  ;;  %v630_v36 = vld [vmem:[%s1664_s1 + $0x130] sm:$0xff] }
  0x18   : > { %725 = vmatpush.msra.mxu1 %v619_v19  ;;  %856 = vmatpush.msra.mxu3 %v650_v21  ;;  %v615_v35 = vld [vmem:[%s1664_s1 + $0xb8] sm:$0xff]  ;;  %v646_v37 = vld [vmem:[%s1664_s1 + $0x1b0] sm:$0xff]  ;;  %v629_v40 = vld [vmem:[%s1664_s1 + $0x128] sm:$0xff] }
  0x19   : > { %661 = vmatpush.msra.mxu0 %v602_v22  ;;  %792 = vmatpush.msra.mxu2 %v633_v24  ;;  %v598_v38 = vld [vmem:[%s1664_s1 + $0x30] sm:$0xff]  ;;  %v645_v41 = vld [vmem:[%s1664_s1 + $0x1a8] sm:$0xff]  ;;  %v628_v44 = vld [vmem:[%s1664_s1 + $0x120] sm:$0xff] }
  0x1a   : > { %726 = vmatpush.msra.mxu1 %v618_v23  ;;  %857 = vmatpush.msra.mxu3 %v649_v25  ;;  %v614_v39 = vld [vmem:[%s1664_s1 + $0xb0] sm:$0xff]  ;;  %v597_v42 = vld [vmem:[%s1664_s1 + $0x28] sm:$0xff]  ;;  %v644_v45 = vld [vmem:[%s1664_s1 + $0x1a0] sm:$0xff] }
  0x1b   : > { %662 = vmatpush.msra.mxu0 %v601_v26  ;;  %793 = vmatpush.msra.mxu2 %v632_v28  ;;  %v613_v43 = vld [vmem:[%s1664_s1 + $0xa8] sm:$0xff]  ;;  %v596_v46 = vld [vmem:[%s1664_s1 + $0x20] sm:$0xff]  ;;  %v627_v48 = vld [vmem:[%s1664_s1 + $0x118] sm:$0xff] }
  0x1c   : > { %727 = vmatpush.msra.mxu1 %v617_v27  ;;  %858 = vmatpush.msra.mxu3 %v648_v29  ;;  %v612_v47 = vld [vmem:[%s1664_s1 + $0xa0] sm:$0xff]  ;;  %v643_v49 = vld [vmem:[%s1664_s1 + $0x198] sm:$0xff]  ;;  %v626_v52 = vld [vmem:[%s1664_s1 + $0x110] sm:$0xff] }
  0x1d   : > { %663 = vmatpush.msra.mxu0 %v600_v30  ;;  %794 = vmatpush.msra.mxu2 %v631_v32  ;;  %v595_v50 = vld [vmem:[%s1664_s1 + $0x18] sm:$0xff]  ;;  %v642_v53 = vld [vmem:[%s1664_s1 + $0x190] sm:$0xff]  ;;  %v625_v56 = vld [vmem:[%s1664_s1 + $0x108] sm:$0xff] }
  0x1e   : > { %728 = vmatpush.msra.mxu1 %v616_v31  ;;  %859 = vmatpush.msra.mxu3 %v647_v33  ;;  %v611_v51 = vld [vmem:[%s1664_s1 + $0x98] sm:$0xff]  ;;  %v594_v54 = vld [vmem:[%s1664_s1 + $0x10] sm:$0xff]  ;;  %v641_v57 = vld [vmem:[%s1664_s1 + $0x188] sm:$0xff] }
  0x1f   : > { %664 = vmatpush.msra.mxu0 %v599_v34  ;;  %795 = vmatpush.msra.mxu2 %v630_v36  ;;  %v610_v55 = vld [vmem:[%s1664_s1 + $0x90] sm:$0xff]  ;;  %v593_v58 = vld [vmem:[%s1664_s1 + $0x8] sm:$0xff]  ;;  %v624_v60 = vld [vmem:[%s1664_s1 + $0x100] sm:$0xff] }
  0x20   : > { %729 = vmatpush.msra.mxu1 %v615_v35  ;;  %860 = vmatpush.msra.mxu3 %v646_v37  ;;  %v609_v59 = vld [vmem:[%s1664_s1 + $0x88] sm:$0xff]  ;;  %v640_v61 = vld [vmem:[%s1664_s1 + $0x180] sm:$0xff]  ;;  %v262_v62 = vld [vmem:[%s1373_s20 + $0x10] sm:$0xff] }
  0x21   : > { %665 = vmatpush.msra.mxu0 %v598_v38  ;;  %796 = vmatpush.msra.mxu2 %v629_v40  ;;  %v263_v63 = vld [vmem:[%s1373_s20 + $0x18] sm:$0xff]  ;;  %v592_v0 = vld [vmem:[%s1664_s1] sm:$0xff]  ;;  %v261_v3 = vld [vmem:[%s1373_s20 + $0x8] sm:$0xff]  ;;  %v433_v16 = vmul.f32 %v262_v62, %v262_v62 }
  0x22   : > { %730 = vmatpush.msra.mxu1 %v614_v39  ;;  %861 = vmatpush.msra.mxu3 %v645_v41  ;;  %v608_v1 = vld [vmem:[%s1664_s1 + $0x80] sm:$0xff]  ;;  %v266_v4 = vld [vmem:[%s1373_s20 + $0x30] sm:$0xff]  ;;  %v267_v5 = vld [vmem:[%s1373_s20 + $0x38] sm:$0xff]  ;;  %v434_v23 = vmul.f32 %v263_v63, %v263_v63  ;;  %v432_v40 = vmul.f32 %v261_v3, %v261_v3 }
  0x23   : > { %666 = vmatpush.msra.mxu0 %v597_v42  ;;  %797 = vmatpush.msra.mxu2 %v628_v44  ;;  %v260_v2 = vld [vmem:[%s1373_s20] sm:$0xff]  ;;  %v265_v7 = vld [vmem:[%s1373_s20 + $0x28] sm:$0xff]  ;;  %v270_v8 = vld [vmem:[%s1373_s20 + $0x50] sm:$0xff]  ;;  %v437_v17 = vmul.f32 %v266_v4, %v266_v4  ;;  %v367_v18 = vadd.f32 %v266_v4, %v262_v62  ;;  %v438_v25 = vmul.f32 %v267_v5, %v267_v5 }
  0x24   : > { %731 = vmatpush.msra.mxu1 %v613_v43  ;;  %862 = vmatpush.msra.mxu3 %v644_v45  ;;  %v264_v6 = vld [vmem:[%s1373_s20 + $0x20] sm:$0xff]  ;;  %v271_v9 = vld [vmem:[%s1373_s20 + $0x58] sm:$0xff]  ;;  %v269_v11 = vld [vmem:[%s1373_s20 + $0x48] sm:$0xff]  ;;  %v441_v22 = vmul.f32 %v270_v8, %v270_v8  ;;  %v431_v24 = vmul.f32 %v260_v2, %v260_v2  ;;  %v388_v30 = vadd.f32 %v267_v5, %v263_v63 }
  0x25   : > { %667 = vmatpush.msra.mxu0 %v596_v46  ;;  %798 = vmatpush.msra.mxu2 %v627_v48  ;;  %v268_v10 = vld [vmem:[%s1373_s20 + $0x40] sm:$0xff]  ;;  %v274_v12 = vld [vmem:[%s1373_s20 + $0x70] sm:$0xff]  ;;  %v275_v13 = vld [vmem:[%s1373_s20 + $0x78] sm:$0xff]  ;;  %v537_v21 = vadd.f32 %v437_v17, %v433_v16  ;;  %v435_v26 = vmul.f32 %v264_v6, %v264_v6  ;;  %v368_v29 = vadd.f32 %v367_v18, %v270_v8 }
  0x26   : > { %732 = vmatpush.msra.mxu1 %v612_v47  ;;  %863 = vmatpush.msra.mxu3 %v643_v49  ;;  %v272_v14 = vld [vmem:[%s1373_s20 + $0x60] sm:$0xff]  ;;  %v1409_v15 = vld [vmem:[%s1373_s20 + $0x68] sm:$0xff]  ;;  %v278_v19 = vld [vmem:[%s1373_s20 + $0x90] sm:$0xff]  ;;  %v325_v31 = vadd.f32 %v264_v6, %v260_v2  ;;  %v445_v33 = vmul.f32 %v274_v12, %v274_v12  ;;  %v558_v34 = vadd.f32 %v438_v25, %v434_v23 }
  0x27   : > { %668 = vmatpush.msra.mxu0 %v595_v50  ;;  %799 = vmatpush.msra.mxu2 %v626_v52  ;;  %v279_v20 = vld [vmem:[%s1373_s20 + $0x98] sm:$0xff]  ;;  %v276_v27 = vld [vmem:[%s1373_s20 + $0x80] sm:$0xff]  ;;  %v1416_v28 = vld [vmem:[%s1373_s20 + $0x88] sm:$0xff]  ;;  %v538_v32 = vadd.f32 %v537_v21, %v441_v22  ;;  %v495_v35 = vadd.f32 %v435_v26, %v431_v24  ;;  %v442_v36 = vmul.f32 %v271_v9, %v271_v9 }
  0x28   : > { %733 = vmatpush.msra.mxu1 %v611_v51  ;;  %864 = vmatpush.msra.mxu3 %v642_v53  ;;  %v439_v37 = vmul.f32 %v268_v10, %v268_v10  ;;  %v346_v38 = vadd.f32 %v265_v7, %v261_v3  ;;  %v369_v39 = vadd.f32 %v368_v29, %v274_v12  ;;  %v282_v44 = vld [vmem:[%s1373_s20 + $0xb0] sm:$0xff]  ;;  %v283_v45 = vld [vmem:[%s1373_s20 + $0xb8] sm:$0xff]  ;;  %v280_v52 = vld [vmem:[%s1373_s20 + $0xa0] sm:$0xff] }
  0x29   : > { %669 = vmatpush.msra.mxu0 %v594_v54  ;;  %800 = vmatpush.msra.mxu2 %v625_v56  ;;  %v436_v41 = vmul.f32 %v265_v7, %v265_v7  ;;  %v389_v42 = vadd.f32 %v388_v30, %v271_v9  ;;  %v326_v43 = vadd.f32 %v325_v31, %v268_v10  ;;  %v281_v53 = vld [vmem:[%s1373_s20 + $0xa8] sm:$0xff]  ;;  %v284_v17 = vld [vmem:[%s1373_s20 + $0xc0] sm:$0xff]  ;;  %v290_v24 = vld [vmem:[%s1373_s20 + $0xf0] sm:$0xff] }
  0x2a   : > { %734 = vmatpush.msra.mxu1 %v610_v55  ;;  %865 = vmatpush.msra.mxu3 %v641_v57  ;;  %v539_v46 = vadd.f32 %v538_v32, %v445_v33  ;;  %v449_v47 = vmul.f32 %v278_v19, %v278_v19  ;;  %v559_v48 = vadd.f32 %v558_v34, %v442_v36  ;;  %v285_v18 = vld [vmem:[%s1373_s20 + $0xc8] sm:$0xff] }
  0x2b   : > { %670 = vmatpush.msra.mxu0 %v593_v58  ;;  %801 = vmatpush.msra.mxu2 %v624_v60  ;;  %v496_v49 = vadd.f32 %v495_v35, %v439_v37  ;;  %v446_v50 = vmul.f32 %v275_v13, %v275_v13  ;;  %v443_v51 = vmul.f32 %v272_v14, %v272_v14  ;;  %v291_v37 = vld [vmem:[%s1373_s20 + $0xf8] sm:$0xff] }
  0x2c   : > { %735 = vmatpush.msra.mxu1 %v609_v59  ;;  %866 = vmatpush.msra.mxu3 %v640_v61  ;;  %v347_v54 = vadd.f32 %v346_v38, %v269_v11  ;;  %v370_v55 = vadd.f32 %v369_v39, %v278_v19  ;;  %v516_v56 = vadd.f32 %v436_v41, %v432_v40  ;;  %v294_v38 = vld [vmem:[%s1373_s20 + $0x110] sm:$0xff]  ;;  %v288_v40 = vld [vmem:[%s1373_s20 + $0xe0] sm:$0xff] }
  0x2d   : > { %802 = vmatmul.f32.vlgmr.msra.gmra.mxu2 %v262_v62  ;;  %867 = vmatmul.f32.vlgmr.msra.gmra.mxu3 %v263_v63  ;;  %v440_v57 = vmul.f32 %v269_v11, %v269_v11  ;;  %v390_v58 = vadd.f32 %v389_v42, %v275_v13  ;;  %v327_v59 = vadd.f32 %v326_v43, %v272_v14 }
  0x2e   : > { %671 = vmatpush.msra.mxu0 %v592_v0  ;;  %736 = vmatpush.msra.mxu1 %v608_v1  ;;  %v540_v60 = vadd.f32 %v539_v46, %v449_v47  ;;  %v453_v61 = vmul.f32 %v282_v44, %v282_v44  ;;  %v560_v62 = vadd.f32 %v559_v48, %v446_v50  ;;  %v289_v46 = vld [vmem:[%s1373_s20 + $0xe8] sm:$0xff] }
  0x2f   : > { %672 = vmatmul.f32.vlgmr.msra.gmra.mxu0 %v260_v2  ;;  %737 = vmatmul.f32.vlgmr.msra.gmra.mxu1 %v261_v3  ;;  %v497_v63 = vadd.f32 %v496_v49, %v443_v51  ;;  %v450_v0 = vmul.f32 %v279_v20, %v279_v20  ;;  %v447_v1 = vmul.f32 %v276_v27, %v276_v27 }
  0x30   : > { %v348_v2 = vadd.f32 %v347_v54, %v1409_v15  ;;  %v371_v3 = vadd.f32 %v370_v55, %v282_v44  ;;  %v451_v16 = vmul.f32 %v280_v52, %v280_v52  ;;  %v461_v26 = vmul.f32 %v290_v24, %v290_v24  ;;  %v295_v55 = vld [vmem:[%s1373_s20 + $0x118] sm:$0xff] }
  0x31   : > { %v455_v31 = vmul.f32 %v284_v17, %v284_v17  ;;  %v452_v35 = vmul.f32 %v281_v53, %v281_v53  ;;  %v465_v41 = vmul.f32 %v294_v38, %v294_v38  ;;  %v456_v50 = vmul.f32 %v285_v18, %v285_v18 }
  0x35   : > { %805 = vmatmul.f32.gmra.mxu2 %v266_v4  ;;  %870 = vmatmul.f32.gmra.mxu3 %v267_v5  ;;  %v517_v4 = vadd.f32 %v516_v56, %v440_v57  ;;  %v444_v5 = vmul.f32 %v1409_v15, %v1409_v15  ;;  %v292_v56 = vld [vmem:[%s1373_s20 + $0x100] sm:$0xff] }
  0x37   : > { %675 = vmatmul.f32.gmra.mxu0 %v264_v6  ;;  %740 = vmatmul.f32.gmra.mxu1 %v265_v7  ;;  %v391_v6 = vadd.f32 %v390_v58, %v279_v20  ;;  %v328_v7 = vadd.f32 %v327_v59, %v276_v27  ;;  %v518_v22 = vadd.f32 %v517_v4, %v444_v5  ;;  %v1447_v4 = vld [vmem:[%s1373_s20 + $0x150] sm:$0xff] }
  0x39   : > { %v329_v23 = vadd.f32 %v328_v7, %v280_v52  ;;  %v296_v7 = vld [vmem:[%s1373_s20 + $0x120] sm:$0xff] }
  0x3b   : > { %v330_v36 = vadd.f32 %v329_v23, %v284_v17  ;;  %v1460_v23 = vld [vmem:[%s1373_s20 + $0x140] sm:$0xff] }
  0x3d   : > { %808 = vmatmul.f32.gmra.mxu2 %v270_v8  ;;  %873 = vmatmul.f32.gmra.mxu3 %v271_v9  ;;  %v286_v8 = vld [vmem:[%s1373_s20 + $0xd0] sm:$0xff]  ;;  %v287_v9 = vld [vmem:[%s1373_s20 + $0xd8] sm:$0xff] }
  0x3e   : > { %v372_v21 = vadd.f32 %v371_v3, %v286_v8  ;;  %v458_v30 = vmul.f32 %v287_v9, %v287_v9 }
  0x3f   : > { %678 = vmatmul.f32.gmra.mxu0 %v268_v10  ;;  %743 = vmatmul.f32.gmra.mxu1 %v269_v11  ;;  %v541_v10 = vadd.f32 %v540_v60, %v453_v61  ;;  %v457_v11 = vmul.f32 %v286_v8, %v286_v8  ;;  %v466_v60 = vmul.f32 %v295_v55, %v295_v55 }
  0x40   : > { %v373_v33 = vadd.f32 %v372_v21, %v290_v24  ;;  %v463_v61 = vmul.f32 %v292_v56, %v292_v56 }
  0x41   : > { %v542_v25 = vadd.f32 %v541_v10, %v457_v11  ;;  %v293_v11 = vld [vmem:[%s1373_s20 + $0x108] sm:$0xff] }
  0x42   : > { %v374_v48 = vadd.f32 %v373_v33, %v294_v38 }
  0x43   : > { %v543_v39 = vadd.f32 %v542_v25, %v461_v26 }
  0x45   : > { %811 = vmatmul.f32.gmra.mxu2 %v274_v12  ;;  %876 = vmatmul.f32.gmra.mxu3 %v275_v13  ;;  %v561_v12 = vadd.f32 %v560_v62, %v450_v0  ;;  %v498_v13 = vadd.f32 %v497_v63, %v447_v1  ;;  %v544_v54 = vadd.f32 %v543_v39, %v465_v41  ;;  %v1476_v39 = vld [vmem:[%s1373_s20 + $0x160] sm:$0xff] }
  0x46   : > { %v460_v1 = vmul.f32 %v289_v46, %v289_v46 }
  0x47   : > { %681 = vmatmul.f32.gmra.mxu0 %v272_v14  ;;  %746 = vmatmul.f32.gmra.mxu1 %v1409_v15  ;;  %v454_v14 = vmul.f32 %v283_v45, %v283_v45  ;;  %v448_v15 = vmul.f32 %v1416_v28, %v1416_v28  ;;  %v499_v29 = vadd.f32 %v498_v13, %v451_v16 }
  0x48   : > { %v467_v13 = vmul.f32 %v296_v7, %v296_v7 }
  0x49   : > { %v519_v34 = vadd.f32 %v518_v22, %v448_v15  ;;  %v500_v43 = vadd.f32 %v499_v29, %v455_v31  ;;  %v1456_v22 = vld [vmem:[%s1373_s20 + $0x170] sm:$0xff] }
  0x4b   : > { %v520_v49 = vadd.f32 %v519_v34, %v452_v35 }
  0x4d   : > { %814 = vmatmul.f32.gmra.mxu2 %v278_v19  ;;  %879 = vmatmul.f32.gmra.mxu3 %v279_v20  ;;  %v349_v19 = vadd.f32 %v348_v2, %v1416_v28  ;;  %v392_v20 = vadd.f32 %v391_v6, %v283_v45  ;;  %v521_v0 = vadd.f32 %v520_v49, %v456_v50  ;;  %v299_v6 = vld [vmem:[%s1373_s20 + $0x138] sm:$0xff] }
  0x4f   : > { %684 = vmatmul.f32.gmra.mxu0 %v276_v27  ;;  %749 = vmatmul.f32.gmra.mxu1 %v1416_v28  ;;  %v562_v27 = vadd.f32 %v561_v12, %v454_v14  ;;  %v350_v32 = vadd.f32 %v349_v19, %v281_v53  ;;  %v393_v28 = vadd.f32 %v392_v20, %v287_v9  ;;  %v303_v20 = vld [vmem:[%s1373_s20 + $0x158] sm:$0xff] }
  0x50   : > { %v470_v12 = vmul.f32 %v299_v6, %v299_v6  ;;  %v474_v29 = vmul.f32 %v303_v20, %v303_v20 }
  0x51   : > { %v563_v42 = vadd.f32 %v562_v27, %v458_v30  ;;  %v351_v47 = vadd.f32 %v350_v32, %v285_v18  ;;  %v394_v51 = vadd.f32 %v393_v28, %v291_v37  ;;  %v297_v27 = vld [vmem:[%s1373_s20 + $0x128] sm:$0xff]  ;;  %v471_v30 = vmul.f32 %v1460_v23, %v1460_v23 }
  0x52   : > { %v468_v34 = vmul.f32 %v297_v27, %v297_v27 }
  0x53   : > { %v352_v62 = vadd.f32 %v351_v47, %v289_v46  ;;  %v395_v2 = vadd.f32 %v394_v51, %v295_v55  ;;  %v1490_v51 = vld [vmem:[%s1373_s20 + $0x1b0] sm:$0xff] }
  0x55   : > { %817 = vmatmul.f32.gmra.mxu2 %v282_v44  ;;  %882 = vmatmul.f32.gmra.mxu3 %v283_v45  ;;  %v462_v44 = vmul.f32 %v291_v37, %v291_v37  ;;  %v459_v45 = vmul.f32 %v288_v40, %v288_v40  ;;  %v353_v14 = vadd.f32 %v352_v62, %v293_v11 }
  0x56   : > { %v396_v19 = vadd.f32 %v395_v2, %v299_v6  ;;  %v1512_v2 = vld [vmem:[%s1373_s20 + $0x1d0] sm:$0xff] }
  0x57   : > { %687 = vmatmul.f32.gmra.mxu0 %v280_v52  ;;  %752 = vmatmul.f32.gmra.mxu1 %v281_v53  ;;  %v331_v52 = vadd.f32 %v330_v36, %v288_v40  ;;  %v1439_v53 = vld [vmem:[%s1373_s20 + $0x130] sm:$0xff]  ;;  %v564_v58 = vadd.f32 %v563_v42, %v462_v44  ;;  %v501_v59 = vadd.f32 %v500_v43, %v459_v45  ;;  %v301_v43 = vld [vmem:[%s1373_s20 + $0x148] sm:$0xff] }
  0x58   : > { %v469_v57 = vmul.f32 %v1439_v53, %v1439_v53  ;;  %v375_v63 = vadd.f32 %v374_v48, %v1439_v53  ;;  %v354_v31 = vadd.f32 %v353_v14, %v297_v27  ;;  %v397_v35 = vadd.f32 %v396_v19, %v303_v20  ;;  %v1470_v36 = vld [vmem:[%s1373_s20 + $0x190] sm:$0xff] }
  0x59   : > { %v332_v3 = vadd.f32 %v331_v52, %v292_v56  ;;  %v502_v10 = vadd.f32 %v501_v59, %v463_v61  ;;  %v475_v45 = vmul.f32 %v1476_v39, %v1476_v39  ;;  %v472_v52 = vmul.f32 %v301_v43, %v301_v43  ;;  %v1501_v59 = vld [vmem:[%s1373_s20 + $0x168] sm:$0xff] }
  0x5a   : > { %v545_v5 = vadd.f32 %v544_v54, %v469_v57  ;;  %v376_v16 = vadd.f32 %v375_v63, %v1447_v4 }
  0x5b   : > { %v333_v21 = vadd.f32 %v332_v3, %v296_v7  ;;  %v503_v26 = vadd.f32 %v502_v10, %v467_v13 }
  0x5c   : > { %v377_v32 = vadd.f32 %v376_v16, %v1456_v22 }
  0x5d   : > { %820 = vmatmul.f32.gmra.mxu2 %v286_v8  ;;  %885 = vmatmul.f32.gmra.mxu3 %v287_v9  ;;  %v473_v8 = vmul.f32 %v1447_v4, %v1447_v4  ;;  %v565_v9 = vadd.f32 %v564_v58, %v466_v60  ;;  %v334_v28 = vadd.f32 %v333_v21, %v1460_v23 }
  0x5e   : > { %v504_v42 = vadd.f32 %v503_v26, %v471_v30  ;;  %v378_v47 = vadd.f32 %v377_v32, %v1470_v36  ;;  %v1553_v30 = vld [vmem:[%s1373_s20 + $0x1f0] sm:$0xff] }
  0x5f   : > { %690 = vmatmul.f32.gmra.mxu0 %v284_v17  ;;  %755 = vmatmul.f32.gmra.mxu1 %v285_v18  ;;  %v522_v17 = vadd.f32 %v521_v0, %v460_v1  ;;  %v464_v18 = vmul.f32 %v293_v11, %v293_v11  ;;  %v546_v15 = vadd.f32 %v545_v5, %v473_v8  ;;  %v1520_v8 = vld [vmem:[%s1373_s20 + $0x1a0] sm:$0xff] }
  0x60   : > { %v566_v25 = vadd.f32 %v565_v9, %v470_v12  ;;  %v335_v50 = vadd.f32 %v334_v28, %v1476_v39  ;;  %v505_v58 = vadd.f32 %v504_v42, %v475_v45  ;;  %v379_v63 = vadd.f32 %v378_v47, %v1490_v51  ;;  %v1525_v12 = vld [vmem:[%s1373_s20 + $0x188] sm:$0xff] }
  0x61   : > { %v523_v33 = vadd.f32 %v522_v17, %v464_v18  ;;  %v476_v5 = vmul.f32 %v1501_v59, %v1501_v59  ;;  %v489_v9 = vmul.f32 %v1512_v2, %v1512_v2  ;;  %v483_v14 = vmul.f32 %v1520_v8, %v1520_v8 }
  0x62   : > { %v567_v41 = vadd.f32 %v566_v25, %v474_v29  ;;  %v380_v17 = vadd.f32 %v379_v63, %v1512_v2  ;;  %v1148_v63 = vmov 0.0  }
  0x63   : > { %v524_v48 = vadd.f32 %v523_v33, %v468_v34  ;;  %v493_v33 = vmul.f32 %v1553_v30, %v1553_v30  ;;  %259 = vst [vmem:[%s1579_s9] sm:$0xff] %v1148_v63 }
  0x64   : > { %v381_v32 = vadd.f32 %v380_v17, %v1553_v30 }
  0x65   : > { %823 = vmatmul.f32.gmra.mxu2 %v290_v24  ;;  %888 = vmatmul.f32.gmra.mxu3 %v291_v37  ;;  %v477_v24 = vmul.f32 %v1456_v22, %v1456_v22  ;;  %v525_v3 = vadd.f32 %v524_v48, %v472_v52  ;;  %v1571_v48 = vld [vmem:[%s1373_s20 + $0x1f8] sm:$0xff] }
  0x67   : > { %693 = vmatmul.f32.gmra.mxu0 %v288_v40  ;;  %758 = vmatmul.f32.gmra.mxu1 %v289_v46  ;;  %v547_v37 = vadd.f32 %v546_v15, %v477_v24  ;;  %v481_v40 = vmul.f32 %v1470_v36, %v1470_v36  ;;  %v355_v46 = vadd.f32 %v354_v31, %v301_v43 }
  0x68   : > { %v526_v21 = vadd.f32 %v525_v3, %v476_v5  ;;  %v480_v15 = vmul.f32 %v1525_v12, %v1525_v12 }
  0x69   : > { %v548_v54 = vadd.f32 %v547_v37, %v481_v40  ;;  %v356_v62 = vadd.f32 %v355_v46, %v1501_v59  ;;  %v382_v40 = vrot.slane %v381_v32, 4 }
  0x6a   : > { %v527_v28 = vadd.f32 %v526_v21, %v480_v15 }
  0x6b   : > { %v357_v16 = vadd.f32 %v356_v62, %v1525_v12  ;;  %v383_v46 = vadd.f32 %v382_v40, %v381_v32 }
  0x6d   : > { %826 = vmatmul.f32.gmra.mxu2 %v294_v38  ;;  %891 = vmatmul.f32.gmra.mxu3 %v295_v55  ;;  %v1473_v38 = vld [vmem:[%s1373_s20 + $0x178] sm:$0xff] }
  0x6e   : > { %v478_v44 = vmul.f32 %v1473_v38, %v1473_v38  ;;  %v398_v49 = vadd.f32 %v397_v35, %v1473_v38  ;;  %v1493_v55 = vld [vmem:[%s1373_s20 + $0x198] sm:$0xff] }
  0x6f   : > { %696 = vmatmul.f32.gmra.mxu0 %v292_v56  ;;  %761 = vmatmul.f32.gmra.mxu1 %v293_v11  ;;  %v485_v56 = vmul.f32 %v1490_v51, %v1490_v51  ;;  %v482_v60 = vmul.f32 %v1493_v55, %v1493_v55 }
  0x70   : > { %v568_v57 = vadd.f32 %v567_v41, %v478_v44  ;;  %v399_v0 = vadd.f32 %v398_v49, %v1493_v55  ;;  %v1565_v44 = vld [vmem:[%s1373_s20 + $0x1c8] sm:$0xff]  ;;  %v1574_v49 = vld [vmem:[%s1373_s20 + $0x1e0] sm:$0xff] }
  0x71   : > { %v491_v52 = vmul.f32 %v1574_v49, %v1574_v49 }
  0x72   : > { %v569_v10 = vadd.f32 %v568_v57, %v482_v60 }
  0x75   : > { %829 = vmatmul.f32.gmra.mxu2 %v1439_v53  ;;  %894 = vmatmul.f32.gmra.mxu3 %v299_v6  ;;  %v1496_v53 = vld [vmem:[%s1373_s20 + $0x180] sm:$0xff]  ;;  %v549_v6 = vadd.f32 %v548_v54, %v485_v56  ;;  %v384_v56 = vrot.slane %v383_v46, 2 }
  0x76   : > { %v479_v61 = vmul.f32 %v1496_v53, %v1496_v53  ;;  %v336_v1 = vadd.f32 %v335_v50, %v1496_v53 }
  0x77   : > { %699 = vmatmul.f32.gmra.mxu0 %v296_v7  ;;  %764 = vmatmul.f32.gmra.mxu1 %v297_v27  ;;  %v1517_v7 = vld [vmem:[%s1373_s20 + $0x1b8] sm:$0xff]  ;;  %v550_v24 = vadd.f32 %v549_v6, %v489_v9  ;;  %v1546_v27 = vld [vmem:[%s1373_s20 + $0x1a8] sm:$0xff]  ;;  %v385_v3 = vadd.f32 %v384_v56, %v383_v46  ;;  %v424_v56 = vlaneseq }
  0x78   : > { %v506_v11 = vadd.f32 %v505_v58, %v479_v61  ;;  %v486_v13 = vmul.f32 %v1517_v7, %v1517_v7  ;;  %v400_v18 = vadd.f32 %v399_v0, %v1517_v7  ;;  %v337_v19 = vadd.f32 %v336_v1, %v1520_v8  ;;  %v1591_v0 = vld [vmem:[%s1373_s20 + $0x1e8] sm:$0xff] }
  0x79   : > { %v358_v31 = vadd.f32 %v357_v16, %v1546_v27  ;;  %v484_v37 = vmul.f32 %v1546_v27, %v1546_v27  ;;  %v551_v41 = vadd.f32 %v550_v24, %v493_v33  ;;  %v488_v1 = vmul.f32 %v1565_v44, %v1565_v44 }
  0x7a   : > { %v570_v25 = vadd.f32 %v569_v10, %v486_v13  ;;  %v507_v26 = vadd.f32 %v506_v11, %v483_v14  ;;  %v386_v11 = vrot.slane %v385_v3, 1  ;;  %v492_v32 = vmul.f32 %v1591_v0, %v1591_v0 }
  0x7b   : > { %v359_v45 = vadd.f32 %v358_v31, %v1565_v44  ;;  %v552_v47 = vrot.slane %v551_v41, 4  ;;  %v528_v54 = vadd.f32 %v527_v28, %v484_v37  ;;  %vm1611_vm3 = vcmp.lt.s32.totalorder %v424_v56, 512 }
  0x7d   : > { %832 = vmatmul.f32.gmra.mxu2 %v1447_v4  ;;  %897 = vmatmul.f32.gmra.mxu3 %v303_v20  ;;  %v1540_v4 = vld [vmem:[%s1373_s20 + $0x1d8] sm:$0xff]  ;;  %v1543_v20 = vld [vmem:[%s1373_s20 + $0x1c0] sm:$0xff]  ;;  %v553_v57 = vadd.f32 %v552_v47, %v551_v41  ;;  %v529_v21 = vadd.f32 %v528_v54, %v488_v1 }
  0x7e   : > { %v490_v29 = vmul.f32 %v1540_v4, %v1540_v4  ;;  %v401_v34 = vadd.f32 %v400_v18, %v1540_v4  ;;  %v338_v35 = vadd.f32 %v337_v19, %v1543_v20 }
  0x7f   : > { %702 = vmatmul.f32.gmra.mxu0 %v1460_v23  ;;  %767 = vmatmul.f32.gmra.mxu1 %v301_v43  ;;  %v487_v23 = vmul.f32 %v1543_v20, %v1543_v20  ;;  %v554_v5 = vrot.slane %v553_v57, 2  ;;  %v530_v37 = vadd.f32 %v529_v21, %v492_v32 }
  0x80   : > { %v571_v42 = vadd.f32 %v570_v25, %v490_v29  ;;  %v402_v50 = vadd.f32 %v401_v34, %v1571_v48  ;;  %v387_v25 = vadd.f32 %v386_v11, %v385_v3 }
  0x81   : > { %v508_v43 = vadd.f32 %v507_v26, %v487_v23  ;;  %v555_v13 = vadd.f32 %v554_v5, %v553_v57 }
  0x82   : > { %v403_v58 = vrot.slane %v402_v50, 4  ;;  %v414_v40 = vrot.slane %v387_v25, 6 }
  0x83   : > { %v509_v62 = vadd.f32 %v508_v43, %v491_v52  ;;  %v556_v15 = vrot.slane %v555_v13, 1 }
  0x84   : > { %v404_v6 = vadd.f32 %v403_v58, %v402_v50 }
  0x85   : > { %835 = vmatmul.f32.gmra.mxu2 %v1456_v22  ;;  %900 = vmatmul.f32.gmra.mxu3 %v1473_v38  ;;  %v494_v22 = vmul.f32 %v1571_v48, %v1571_v48  ;;  %v339_v38 = vadd.f32 %v338_v35, %v1574_v49  ;;  %v510_v10 = vrot.slane %v509_v62, 4  ;;  %v557_v33 = vadd.f32 %v556_v15, %v555_v13 }
  0x86   : > { %v405_v16 = vrot.slane %v404_v6, 2 }
  0x87   : > { %705 = vmatmul.f32.gmra.mxu0 %v1476_v39  ;;  %770 = vmatmul.f32.gmra.mxu1 %v1501_v59  ;;  %v572_v60 = vadd.f32 %v571_v42, %v494_v22  ;;  %v340_v61 = vrot.slane %v339_v38, 4  ;;  %v360_v39 = vadd.f32 %v359_v45, %v1591_v0  ;;  %v511_v19 = vadd.f32 %v510_v10, %v509_v62 }
  0x88   : > { %v406_v26 = vadd.f32 %v405_v16, %v404_v6  ;;  %v531_v45 = vrot.slane %v530_v37, 4  ;;  %v1092_v6 = vld [vmem:[%s1579_s9 + $0x1] ss:$2 sm:$0xf] }
  0x89   : > { %v573_v59 = vrot.slane %v572_v60, 4  ;;  %v341_v9 = vadd.f32 %v340_v61, %v339_v38  ;;  %v361_v14 = vrot.slane %v360_v39, 4  ;;  %v512_v35 = vrot.slane %v511_v19, 2 }
  0x8a   : > { %v407_v34 = vrot.slane %v406_v26, 1  ;;  %v532_v38 = vadd.f32 %v531_v45, %v530_v37 }
  0x8b   : > { %v574_v17 = vadd.f32 %v573_v59, %v572_v60  ;;  %v342_v18 = vrot.slane %v341_v9, 2  ;;  %v362_v24 = vadd.f32 %v361_v14, %v360_v39  ;;  %v513_v47 = vadd.f32 %v512_v35, %v511_v19  ;;  %v324_v60 = vld [vmem:[%s1579_s9] ss:$2 sm:$0xf] }
  0x8c   : > { %v408_v41 = vadd.f32 %v407_v34, %v406_v26  ;;  %v533_v58 = vrot.slane %v532_v38, 2 }
  0x8d   : > { %838 = vmatmul.f32.gmra.mxu2 %v1470_v36  ;;  %903 = vmatmul.f32.gmra.mxu3 %v1493_v55  ;;  %v575_v29 = vrot.slane %v574_v17, 2  ;;  %v343_v23 = vadd.f32 %v342_v18, %v341_v9  ;;  %v363_v31 = vrot.slane %v362_v24, 2 }
  0x8e   : > { %v415_v46 = vrot.slane %v408_v41, 5  ;;  %v534_v62 = vadd.f32 %v533_v58, %v532_v38 }
  0x8f   : > { %708 = vmatmul.f32.gmra.mxu0 %v1496_v53  ;;  %773 = vmatmul.f32.gmra.mxu1 %v1525_v12  ;;  %v576_v36 = vadd.f32 %v575_v29, %v574_v17  ;;  %v344_v55 = vrot.slane %v343_v23, 1  ;;  %v364_v28 = vadd.f32 %v363_v31, %v362_v24  ;;  %v584_v53 = vrot.slane %v557_v33, 6 }
  0x90   : > { %v419_v52 = vsel %vm418_vm0, %v414_v40, %v415_v46 }
  0x91   : > { %v577_v42 = vrot.slane %v576_v36, 1  ;;  %v365_v43 = vrot.slane %v364_v28, 1  ;;  %v345_v50 = vadd.f32 %v344_v55, %v343_v23 }
  0x93   : > { %v578_v12 = vadd.f32 %v577_v42, %v576_v36  ;;  %v366_v22 = vadd.f32 %v365_v43, %v364_v28 }
  0x95   : > { %841 = vmatmul.f32.gmra.mxu2 %v1490_v51  ;;  %906 = vmatmul.f32.gmra.mxu3 %v1517_v7  ;;  %v585_v54 = vrot.slane %v578_v12, 5  ;;  %v413_v57 = vrot.slane %v366_v22, 7  ;;  %v514_v7 = vrot.slane %v513_v47, 1 }
  0x97   : > { %711 = vmatmul.f32.gmra.mxu0 %v1520_v8  ;;  %776 = vmatmul.f32.gmra.mxu1 %v1546_v27  ;;  %v587_v51 = vsel %vm418_vm0, %v584_v53, %v585_v54  ;;  %v417_v61 = vsel %vm416_vm1, %v345_v50, %v413_v57  ;;  %v535_v27 = vrot.slane %v534_v62, 1  ;;  %v515_v3 = vadd.f32 %v514_v7, %v513_v47 }
  0x98   : > { %v421_v63 = vsel %vm420_vm2, %v417_v61, %v419_v52 }
  0x99   : > { %v423_v8 = vadd.f32 %v421_v63, %v324_v60  ;;  %v536_v5 = vadd.f32 %v535_v27, %v534_v62 }
  0x9b   : > { %428 = vst.msk [vmem:[%s1579_s9] ss:$2 sm:$0xf] %vm1611_vm3, %v423_v8  ;;  %v583_v39 = vrot.slane %v536_v5, 7 }
  0x9d   : > { %844 = vmatmul.f32.gmra.mxu2 %v1512_v2  ;;  %909 = vmatmul.f32.gmra.mxu3 %v1540_v4  ;;  %v586_v59 = vsel %vm416_vm1, %v515_v3, %v583_v39 }
  0x9e   : > { %v588_v9 = vsel %vm420_vm2, %v586_v59, %v587_v51 }
  0x9f   : > { %714 = vmatmul.f32.gmra.mxu0 %v1543_v20  ;;  %779 = vmatmul.f32.gmra.mxu1 %v1565_v44  ;;  %v590_v10 = vadd.f32 %v1092_v6, %v588_v9 }
  0xa1   : > { %1093 = vst.msk [vmem:[%s1579_s9 + $0x1] ss:$2 sm:$0xf] %vm1611_vm3, %v590_v10 }
  0xa5   : > { %847 = vmatmul.f32.gmra.mxu2 %v1553_v30  ;;  %912 = vmatmul.f32.gmra.mxu3 %v1571_v48 }
  0xa7   : > { %717 = vmatmul.f32.gmra.mxu0 %v1574_v49  ;;  %782 = vmatmul.f32.gmra.mxu1 %v1591_v0 }
  0xac   : > { %v673_v2 = vpop.f32.mrf.mxu0  ;;  %v738_v4 = vpop.f32.mrf.mxu1 }
  0xad   : > { %v739_v20 = vadd.f32 %v738_v4, %v673_v2 }
  0xb0   : > { %v803_v44 = vpop.f32.mrf.mxu2  ;;  %v868_v11 = vpop.f32.mrf.mxu3 }
  0xb1   : > { %v804_v13 = vadd.f32 %v803_v44, %v739_v20 }
  0xb3   : > { %v869_v30 = vadd.f32 %v868_v11, %v804_v13 }
  0xb4   : > { %v676_v48 = vpop.f32.mrf.mxu0  ;;  %v741_v14 = vpop.f32.mrf.mxu1 }
  0xb5   : > { %916 = vst [vmem:[%s1636_s17] sm:$0xff] %v869_v30  ;;  %v742_v49 = vadd.f32 %v741_v14, %v676_v48 }
  0xb8   : > { %v806_v0 = vpop.f32.mrf.mxu2  ;;  %v871_v16 = vpop.f32.mrf.mxu3 }
  0xb9   : > { %v807_v17 = vadd.f32 %v806_v0, %v742_v49 }
  0xbb   : > { %v872_v18 = vadd.f32 %v871_v16, %v807_v17 }
  0xbc   : > { %v679_v19 = vpop.f32.mrf.mxu0  ;;  %v744_v21 = vpop.f32.mrf.mxu1 }
  0xbd   : > { %917 = vst [vmem:[%s1636_s17 + $0x8] sm:$0xff] %v872_v18  ;;  %v745_v15 = vadd.f32 %v744_v21, %v679_v19 }
  0xc0   : > { %v809_v24 = vpop.f32.mrf.mxu2  ;;  %v874_v25 = vpop.f32.mrf.mxu3 }
  0xc1   : > { %v810_v26 = vadd.f32 %v809_v24, %v745_v15 }
  0xc3   : > { %v875_v29 = vadd.f32 %v874_v25, %v810_v26 }
  0xc4   : > { %v682_v23 = vpop.f32.mrf.mxu0  ;;  %v747_v31 = vpop.f32.mrf.mxu1 }
  0xc5   : > { %918 = vst [vmem:[%s1636_s17 + $0x10] sm:$0xff] %v875_v29  ;;  %v748_v32 = vadd.f32 %v747_v31, %v682_v23 }
  0xc8   : > { %v812_v33 = vpop.f32.mrf.mxu2  ;;  %v877_v34 = vpop.f32.mrf.mxu3 }
  0xc9   : > { %v813_v36 = vadd.f32 %v812_v33, %v748_v32 }
  0xcb   : > { %v878_v35 = vadd.f32 %v877_v34, %v813_v36 }
  0xcc   : > { %v685_v55 = vpop.f32.mrf.mxu0  ;;  %v750_v28 = vpop.f32.mrf.mxu1 }
  0xcd   : > { %919 = vst [vmem:[%s1636_s17 + $0x18] sm:$0xff] %v878_v35  ;;  %v751_v37 = vadd.f32 %v750_v28, %v685_v55 }
  0xd0   : > { %v815_v40 = vpop.f32.mrf.mxu2  ;;  %v880_v41 = vpop.f32.mrf.mxu3 }
  0xd1   : > { %v816_v42 = vadd.f32 %v815_v40, %v751_v37 }
  0xd3   : > { %v881_v43 = vadd.f32 %v880_v41, %v816_v42 }
  0xd4   : > { %v688_v45 = vpop.f32.mrf.mxu0  ;;  %v753_v53 = vpop.f32.mrf.mxu1 }
  0xd5   : > { %920 = vst [vmem:[%s1636_s17 + $0x20] sm:$0xff] %v881_v43  ;;  %v754_v46 = vadd.f32 %v753_v53, %v688_v45 }
  0xd8   : > { %v818_v12 = vpop.f32.mrf.mxu2  ;;  %v883_v47 = vpop.f32.mrf.mxu3 }
  0xd9   : > { %v819_v50 = vadd.f32 %v818_v12, %v754_v46 }
  0xdb   : > { %v884_v22 = vadd.f32 %v883_v47, %v819_v50 }
  0xdc   : > { %v691_v38 = vpop.f32.mrf.mxu0  ;;  %v756_v52 = vpop.f32.mrf.mxu1 }
  0xdd   : > { %921 = vst [vmem:[%s1636_s17 + $0x28] sm:$0xff] %v884_v22  ;;  %v757_v54 = vadd.f32 %v756_v52, %v691_v38 }
  0xe0   : > { %v821_v56 = vpop.f32.mrf.mxu2  ;;  %v886_v57 = vpop.f32.mrf.mxu3 }
  0xe1   : > { %v822_v58 = vadd.f32 %v821_v56, %v757_v54 }
  0xe3   : > { %v887_v51 = vadd.f32 %v886_v57, %v822_v58 }
  0xe4   : > { %v694_v60 = vpop.f32.mrf.mxu0  ;;  %v759_v7 = vpop.f32.mrf.mxu1 }
  0xe5   : > { %922 = vst [vmem:[%s1636_s17 + $0x30] sm:$0xff] %v887_v51  ;;  %v760_v61 = vadd.f32 %v759_v7, %v694_v60 }
  0xe8   : > { %v824_v62 = vpop.f32.mrf.mxu2  ;;  %v889_v63 = vpop.f32.mrf.mxu3 }
  0xe9   : > { %v825_v1 = vadd.f32 %v824_v62, %v760_v61 }
  0xeb   : > { %v890_v8 = vadd.f32 %v889_v63, %v825_v1 }
  0xec   : > { %v697_v27 = vpop.f32.mrf.mxu0  ;;  %v762_v3 = vpop.f32.mrf.mxu1 }
  0xed   : > { %923 = vst [vmem:[%s1636_s17 + $0x38] sm:$0xff] %v890_v8  ;;  %v763_v5 = vadd.f32 %v762_v3, %v697_v27 }
  0xf0   : > { %v827_v39 = vpop.f32.mrf.mxu2  ;;  %v892_v6 = vpop.f32.mrf.mxu3 }
  0xf1   : > { %v828_v59 = vadd.f32 %v827_v39, %v763_v5 }
  0xf3   : > { %v893_v9 = vadd.f32 %v892_v6, %v828_v59 }
  0xf4   : > { %v700_v10 = vpop.f32.mrf.mxu0  ;;  %v765_v2 = vpop.f32.mrf.mxu1 }
  0xf5   : > { %924 = vst [vmem:[%s1636_s17 + $0x40] sm:$0xff] %v893_v9  ;;  %v766_v4 = vadd.f32 %v765_v2, %v700_v10 }
  0xf8   : > { %v830_v20 = vpop.f32.mrf.mxu2  ;;  %v895_v44 = vpop.f32.mrf.mxu3 }
  0xf9   : > { %v831_v11 = vadd.f32 %v830_v20, %v766_v4 }
  0xfb   : > { %v896_v13 = vadd.f32 %v895_v44, %v831_v11 }
  0xfc   : > { %v703_v30 = vpop.f32.mrf.mxu0  ;;  %v768_v48 = vpop.f32.mrf.mxu1 }
  0xfd   : > { %925 = vst [vmem:[%s1636_s17 + $0x48] sm:$0xff] %v896_v13  ;;  %v769_v14 = vadd.f32 %v768_v48, %v703_v30 }
 0x100   : > { %v833_v49 = vpop.f32.mrf.mxu2  ;;  %v898_v0 = vpop.f32.mrf.mxu3 }
 0x101   : > { %v834_v16 = vadd.f32 %v833_v49, %v769_v14 }
 0x103   : > { %v899_v17 = vadd.f32 %v898_v0, %v834_v16 }
 0x104   : > { %v706_v18 = vpop.f32.mrf.mxu0  ;;  %v771_v19 = vpop.f32.mrf.mxu1 }
 0x105   : > { %926 = vst [vmem:[%s1636_s17 + $0x50] sm:$0xff] %v899_v17  ;;  %v772_v21 = vadd.f32 %v771_v19, %v706_v18 }
 0x108   : > { %v836_v15 = vpop.f32.mrf.mxu2  ;;  %v901_v24 = vpop.f32.mrf.mxu3 }
 0x109   : > { %v837_v25 = vadd.f32 %v836_v15, %v772_v21 }
 0x10b   : > { %v902_v26 = vadd.f32 %v901_v24, %v837_v25 }
 0x10c   : > { %v709_v29 = vpop.f32.mrf.mxu0  ;;  %v774_v23 = vpop.f32.mrf.mxu1 }
 0x10d   : > { %927 = vst [vmem:[%s1636_s17 + $0x58] sm:$0xff] %v902_v26  ;;  %v775_v31 = vadd.f32 %v774_v23, %v709_v29 }
 0x110   : > { %v839_v32 = vpop.f32.mrf.mxu2  ;;  %v904_v33 = vpop.f32.mrf.mxu3 }
 0x111   : > { %v840_v34 = vadd.f32 %v839_v32, %v775_v31 }
 0x113   : > { %v905_v36 = vadd.f32 %v904_v33, %v840_v34 }
 0x114   : > { %v712_v35 = vpop.f32.mrf.mxu0  ;;  %v777_v55 = vpop.f32.mrf.mxu1 }
 0x115   : > { %928 = vst [vmem:[%s1636_s17 + $0x60] sm:$0xff] %v905_v36  ;;  %v778_v28 = vadd.f32 %v777_v55, %v712_v35 }
 0x118   : > { %v842_v37 = vpop.f32.mrf.mxu2  ;;  %v907_v40 = vpop.f32.mrf.mxu3 }
 0x119   : > { %v843_v41 = vadd.f32 %v842_v37, %v778_v28 }
 0x11b   : > { %v908_v42 = vadd.f32 %v907_v40, %v843_v41 }
 0x11c   : > { %v715_v43 = vpop.f32.mrf.mxu0  ;;  %v780_v45 = vpop.f32.mrf.mxu1 }
 0x11d   : > { %929 = vst [vmem:[%s1636_s17 + $0x68] sm:$0xff] %v908_v42  ;;  %v781_v53 = vadd.f32 %v780_v45, %v715_v43 }
 0x120   : > { %v845_v46 = vpop.f32.mrf.mxu2  ;;  %v910_v12 = vpop.f32.mrf.mxu3 }
 0x121   : > { %v846_v47 = vadd.f32 %v845_v46, %v781_v53 }
 0x123   : > { %v911_v50 = vadd.f32 %v910_v12, %v846_v47 }
 0x124   : > { %v718_v22 = vpop.f32.mrf.mxu0  ;;  %v783_v38 = vpop.f32.mrf.mxu1 }
 0x125   : > { %930 = vst [vmem:[%s1636_s17 + $0x70] sm:$0xff] %v911_v50  ;;  %v784_v52 = vadd.f32 %v783_v38, %v718_v22 }
 0x128   : > { %v848_v54 = vpop.f32.mrf.mxu2  ;;  %v913_v56 = vpop.f32.mrf.mxu3 }
 0x129   : > { %v849_v57 = vadd.f32 %v848_v54, %v784_v52 }
 0x12b   : > { %v914_v58 = vadd.f32 %v913_v56, %v849_v57 }
 0x12d   : > { %931 = vst [vmem:[%s1636_s17 + $0x78] sm:$0xff] %v914_v58 }
 0x12e PF: > { %s14_s14 = sadd.s32 1, %s1146_s14   ;;  %s1669_s12 = smov %s1142_s13 }
 0x12f   : > { %p11_p5 = scmp.ge.s32.totalorder %s14_s14, 4   ;;  %s1670_s13 = smov %s1672_s15 }
 0x131   :  { %13 = sbr.rel (!%p11_p5) target bundleno = 2 (0x2), region = 75 }

</bundles_post_ra>
